<compile_context>
chip_gen: v7x
topology: tpu7x:2x2x1
jax: 0.10.0
libtpu: 0.0.40
codegen_flags: <defaults>
</compile_context>

<pallas_src>
import jax
import jax.numpy as jnp
import numpy as np
from jax.experimental import pallas as pl
from jax.experimental.pallas import tpu as pltpu

# Normalization constants from the PyTorch module.
MAX = np.array([4.0, 9.0], dtype=np.float32)
MIN = np.array([0.0, 0.0], dtype=np.float32)

IN_DIM = 2
HID_DIM = 200
OUT_DIM = 4

# Lane-aligned padded sizes (128-lane vregs / 128- and 256-wide MXU tiles).
HID_PAD = 256
OUT_PAD = 128

TILE_B_MAX = 512  # batch tile; ~1.3 MB of f32 activations per step -> safe on v7x VMEM


def mlp_kernel(x_ref, w1_ref, b1_ref, w2_ref, b2_ref, w3_ref, b3_ref, o_ref):
    x = x_ref[...]                                        # (TILE_B, 2)

    # fc1 (K=2) as two VPU broadcast FMAs; normalization already folded in.
    h1 = (x[:, 0:1] * w1_ref[0:1, :]
          + x[:, 1:2] * w1_ref[1:2, :]
          + b1_ref[...])                                  # (TILE_B, 256)
    h1 = jnp.maximum(h1, 0.0)

    # fc2 + ReLU -- the only real matmul, MXU with f32 accumulation.
    h2 = jnp.dot(h1, w2_ref[...], preferred_element_type=jnp.float32) + b2_ref[...]
    h2 = jnp.maximum(h2, 0.0)                             # (TILE_B, 256)

    # linear_out, lane-padded to 128 so the store is a full-lane (unmasked) vst.
    out = jnp.dot(h2, w3_ref[...], preferred_element_type=jnp.float32) + b3_ref[...]
    o_ref[...] = out.astype(o_ref.dtype)                  # (TILE_B, 128)


def prepare_params(params):
    """Fold the input normalization into fc1 and zero-pad all parameters to
    lane-aligned shapes (200 -> 256, 4 -> 128). Padding is exact: padded h1/h2
    columns are ReLU(0) = 0 and padded output columns are 0 (sliced off)."""
    s = jnp.asarray(1.0 / (MAX - MIN), jnp.float32)       # (2,)
    t = jnp.asarray(-MIN / (MAX - MIN), jnp.float32)      # (2,)

    w1 = params["w1"] * s[:, None]                        # (2, 200)
    b1 = params["b1"] + t[None, :] @ params["w1"]         # (1, 200)

    w1p = jnp.zeros((IN_DIM, HID_PAD), jnp.float32).at[:, :HID_DIM].set(w1)
    b1p = jnp.zeros((1, HID_PAD), jnp.float32).at[:, :HID_DIM].set(b1)
    w2p = jnp.zeros((HID_PAD, HID_PAD), jnp.float32).at[:HID_DIM, :HID_DIM].set(params["w2"])
    b2p = jnp.zeros((1, HID_PAD), jnp.float32).at[:, :HID_DIM].set(params["b2"])
    w3p = jnp.zeros((HID_PAD, OUT_PAD), jnp.float32).at[:HID_DIM, :OUT_DIM].set(params["w3"])
    b3p = jnp.zeros((1, OUT_PAD), jnp.float32).at[:, :OUT_DIM].set(params["b3"])
    return {"w1": w1p, "b1": b1p, "w2": w2p, "b2": b2p, "w3": w3p, "b3": b3p}


def mlp_forward(x, prepped):
    """x: (B, 2) float32. prepped: output of prepare_params (padded/folded)."""
    B = x.shape[0]

    # Batch tile: multiple of 8 (sublanes), capped at TILE_B_MAX; pad B up so
    # every block is full (padded rows are discarded by the final slice).
    tile_b = min(TILE_B_MAX, ((B + 7) // 8) * 8)
    b_pad = ((B + tile_b - 1) // tile_b) * tile_b
    if b_pad != B:
        x = jnp.pad(x, ((0, b_pad - B), (0, 0)))

    grid = (b_pad // tile_b,)

    def resident(shape):
        # Full array as a single block with a constant index_map ->
        # weights stay resident in VMEM across the batch grid.
        return pl.BlockSpec(shape, lambda i: (0, 0))

    out_padded = pl.pallas_call(
        mlp_kernel,
        out_shape=jax.ShapeDtypeStruct((b_pad, OUT_PAD), jnp.float32),
        grid=grid,
        in_specs=[
            pl.BlockSpec((tile_b, IN_DIM), lambda i: (i, 0)),   # x, tiled over batch
            resident((IN_DIM, HID_PAD)),                        # w1 (folded)
            resident((1, HID_PAD)),                             # b1 (folded)
            resident((HID_PAD, HID_PAD)),                       # w2
            resident((1, HID_PAD)),                             # b2
            resident((HID_PAD, OUT_PAD)),                       # w3
            resident((1, OUT_PAD)),                             # b3
        ],
        out_specs=pl.BlockSpec((tile_b, OUT_PAD), lambda i: (i, 0)),
        compiler_params=pltpu.CompilerParams(
            dimension_semantics=("parallel",),      # megacore / v7x 2-TC sharding
            vmem_limit_bytes=64 * 1024 * 1024,
        ),
    )(x, prepped["w1"], prepped["b1"], prepped["w2"], prepped["b2"],
      prepped["w3"], prepped["b3"])

    return out_padded[:B, :OUT_DIM]


def init_params(key):
    """PyTorch-default-style uniform init; linear_out zero-initialized as in the module."""
    k1, k2, k3, k4 = jax.random.split(key, 4)

    def uniform(k, shape, fan_in):
        bound = 1.0 / np.sqrt(fan_in)
        return jax.random.uniform(k, shape, jnp.float32, -bound, bound)

    return {
        # stored as (in, out): transpose of PyTorch's (out, in)
        "w1": uniform(k1, (IN_DIM, HID_DIM), IN_DIM),
        "b1": uniform(k2, (1, HID_DIM), IN_DIM),
        "w2": uniform(k3, (HID_DIM, HID_DIM), HID_DIM),
        "b2": uniform(k4, (1, HID_DIM), HID_DIM),
        "w3": jnp.zeros((HID_DIM, OUT_DIM), jnp.float32),
        "b3": jnp.zeros((1, OUT_DIM), jnp.float32),
    }


def mlp_reference(x, params):
    """Pure-JAX reference matching the PyTorch forward (no folding / padding)."""
    xn = (x - MIN.reshape(1, -1)) / (MAX.reshape(1, -1) - MIN.reshape(1, -1))
    h1 = jnp.maximum(xn @ params["w1"] + params["b1"], 0.0)
    h2 = jnp.maximum(h1 @ params["w2"] + params["b2"], 0.0)
    return h2 @ params["w3"] + params["b3"]


if __name__ == "__main__":
    key = jax.random.PRNGKey(0)
    pkey, xkey, wkey, bkey = jax.random.split(key, 4)

    # Spec-faithful params (linear_out zero-initialized).
    params = init_params(pkey)

    # Second param set with non-zero linear_out so the numeric check exercises
    # all three layers (the spec init makes the output identically zero).
    params_nz = dict(params)
    params_nz["w3"] = 0.1 * jax.random.normal(wkey, (HID_DIM, OUT_DIM), jnp.float32)
    params_nz["b3"] = 0.1 * jax.random.normal(bkey, (1, OUT_DIM), jnp.float32)

    for B, p in ((8, params_nz), (5, params_nz), (8, params)):
        xk = jax.random.fold_in(xkey, B)
        x = jax.random.uniform(xk, (B, IN_DIM), jnp.float32) * jnp.asarray(MAX)[None, :]

        out = jax.block_until_ready(mlp_forward(x, prepare_params(p)))
        ref = mlp_reference(x, p)

        np.testing.assert_allclose(np.asarray(out), np.asarray(ref),
                                   rtol=1e-5, atol=1e-5)
        assert out.shape == (B, OUT_DIM)

    print("KERNEL_OK")
</pallas_src>

<mosaic_0001>
module attributes {stable_mosaic.version = 11 : i64} {
  func.func @mlp_kernel(%arg0: i32, %arg1: memref<8x2xf32, #tpu.memory_space<vmem>>, %arg2: memref<2x256xf32, #tpu.memory_space<vmem>>, %arg3: memref<1x256xf32, #tpu.memory_space<vmem>>, %arg4: memref<256x256xf32, #tpu.memory_space<vmem>>, %arg5: memref<1x256xf32, #tpu.memory_space<vmem>>, %arg6: memref<256x128xf32, #tpu.memory_space<vmem>>, %arg7: memref<1x128xf32, #tpu.memory_space<vmem>>, %arg8: memref<8x128xf32, #tpu.memory_space<vmem>>) attributes {dimension_semantics = [#tpu.dimension_semantics<parallel>], iteration_bounds = array<i64: 1>, scalar_prefetch = 0 : i64, scratch_operands = 0 : i64, tpu.core_type = #tpu.core_type<tc>, window_params = [{transform_indices = @transform_0, window_bounds = array<i64: 8, 2>}, {pipeline_mode = #tpu.pipeline_mode<synchronous>, transform_indices = @transform_1, window_bounds = array<i64: 2, 256>}, {pipeline_mode = #tpu.pipeline_mode<synchronous>, transform_indices = @transform_2, window_bounds = array<i64: 1, 256>}, {pipeline_mode = #tpu.pipeline_mode<synchronous>, transform_indices = @transform_3, window_bounds = array<i64: 256, 256>}, {pipeline_mode = #tpu.pipeline_mode<synchronous>, transform_indices = @transform_4, window_bounds = array<i64: 1, 256>}, {pipeline_mode = #tpu.pipeline_mode<synchronous>, transform_indices = @transform_5, window_bounds = array<i64: 256, 128>}, {pipeline_mode = #tpu.pipeline_mode<synchronous>, transform_indices = @transform_6, window_bounds = array<i64: 1, 128>}, {transform_indices = @transform_7, window_bounds = array<i64: 8, 128>}]} {
    %c0 = arith.constant 0 : index
    %c0_0 = arith.constant 0 : index
    %0 = vector.load %arg1[%c0, %c0_0] : memref<8x2xf32, #tpu.memory_space<vmem>>, vector<8x2xf32>
    %1 = vector.extract_strided_slice %0 {offsets = [0, 0], sizes = [8, 1], strides = [1, 1]} : vector<8x2xf32> to vector<8x1xf32>
    %c0_1 = arith.constant 0 : index
    %c0_2 = arith.constant 0 : index
    %2 = vector.load %arg2[%c0_1, %c0_2] : memref<2x256xf32, #tpu.memory_space<vmem>>, vector<1x256xf32>
    %3 = vector.broadcast %1 : vector<8x1xf32> to vector<8x256xf32>
    %4 = vector.broadcast %2 : vector<1x256xf32> to vector<8x256xf32>
    %5 = arith.mulf %3, %4 : vector<8x256xf32>
    %6 = vector.extract_strided_slice %0 {offsets = [0, 1], sizes = [8, 1], strides = [1, 1]} : vector<8x2xf32> to vector<8x1xf32>
    %c1 = arith.constant 1 : index
    %c0_3 = arith.constant 0 : index
    %7 = vector.load %arg2[%c1, %c0_3] : memref<2x256xf32, #tpu.memory_space<vmem>>, vector<1x256xf32>
    %8 = vector.broadcast %6 : vector<8x1xf32> to vector<8x256xf32>
    %9 = vector.broadcast %7 : vector<1x256xf32> to vector<8x256xf32>
    %10 = arith.mulf %8, %9 : vector<8x256xf32>
    %11 = arith.addf %5, %10 : vector<8x256xf32>
    %c0_4 = arith.constant 0 : index
    %c0_5 = arith.constant 0 : index
    %12 = vector.load %arg3[%c0_4, %c0_5] : memref<1x256xf32, #tpu.memory_space<vmem>>, vector<1x256xf32>
    %13 = vector.broadcast %12 : vector<1x256xf32> to vector<8x256xf32>
    %14 = arith.addf %11, %13 : vector<8x256xf32>
    %cst = arith.constant 0.000000e+00 : f32
    %15 = vector.broadcast %cst : f32 to vector<8x256xf32>
    %16 = arith.maximumf %14, %15 : vector<8x256xf32>
    %c0_6 = arith.constant 0 : index
    %c0_7 = arith.constant 0 : index
    %17 = vector.load %arg4[%c0_6, %c0_7] : memref<256x256xf32, #tpu.memory_space<vmem>>, vector<256x256xf32>
    %cst_8 = arith.constant dense<0.000000e+00> : vector<8x256xf32>
    %18 = tpu.matmul %16, %17, %cst_8 {dimension_numbers = #tpu.dot_dimension_numbers<[1], [0], [0], [1], [0, 0, 1, 1], [], []>} : vector<8x256xf32>, vector<256x256xf32>, vector<8x256xf32> -> vector<8x256xf32>
    %c0_9 = arith.constant 0 : index
    %c0_10 = arith.constant 0 : index
    %19 = vector.load %arg5[%c0_9, %c0_10] : memref<1x256xf32, #tpu.memory_space<vmem>>, vector<1x256xf32>
    %20 = vector.broadcast %19 : vector<1x256xf32> to vector<8x256xf32>
    %21 = arith.addf %18, %20 : vector<8x256xf32>
    %cst_11 = arith.constant 0.000000e+00 : f32
    %22 = vector.broadcast %cst_11 : f32 to vector<8x256xf32>
    %23 = arith.maximumf %21, %22 : vector<8x256xf32>
    %c0_12 = arith.constant 0 : index
    %c0_13 = arith.constant 0 : index
    %24 = vector.load %arg6[%c0_12, %c0_13] : memref<256x128xf32, #tpu.memory_space<vmem>>, vector<256x128xf32>
    %cst_14 = arith.constant dense<0.000000e+00> : vector<8x128xf32>
    %25 = tpu.matmul %23, %24, %cst_14 {dimension_numbers = #tpu.dot_dimension_numbers<[1], [0], [0], [1], [0, 0, 1, 1], [], []>} : vector<8x256xf32>, vector<256x128xf32>, vector<8x128xf32> -> vector<8x128xf32>
    %c0_15 = arith.constant 0 : index
    %c0_16 = arith.constant 0 : index
    %26 = vector.load %arg7[%c0_15, %c0_16] : memref<1x128xf32, #tpu.memory_space<vmem>>, vector<1x128xf32>
    %27 = vector.broadcast %26 : vector<1x128xf32> to vector<8x128xf32>
    %28 = arith.addf %25, %27 : vector<8x128xf32>
    %c0_17 = arith.constant 0 : index
    %c0_18 = arith.constant 0 : index
    %29 = vector.load %arg8[%c0_17, %c0_18] : memref<8x128xf32, #tpu.memory_space<vmem>>, vector<8x128xf32>
    tpu.vector_store %arg8[%c0_17, %c0_18], %28 {strides = array<i32>} : memref<8x128xf32, #tpu.memory_space<vmem>>, vector<8x128xf32>,
    return
  }
  func.func @transform_0(%arg0: i32) -> (i32, i32) {
    %c0_i32 = arith.constant 0 : i32
    %c0_i32_0 = arith.constant 0 : i32
    return %arg0, %c0_i32 : i32, i32
  }
  func.func @transform_1(%arg0: i32) -> (i32, i32) {
    %c0_i32 = arith.constant 0 : i32
    %c0_i32_0 = arith.constant 0 : i32
    %c0_i32_1 = arith.constant 0 : i32
    return %c0_i32, %c0_i32_0 : i32, i32
  }
  func.func @transform_2(%arg0: i32) -> (i32, i32) {
    %c0_i32 = arith.constant 0 : i32
    %c0_i32_0 = arith.constant 0 : i32
    %c0_i32_1 = arith.constant 0 : i32
    return %c0_i32, %c0_i32_0 : i32, i32
  }
  func.func @transform_3(%arg0: i32) -> (i32, i32) {
    %c0_i32 = arith.constant 0 : i32
    %c0_i32_0 = arith.constant 0 : i32
    %c0_i32_1 = arith.constant 0 : i32
    return %c0_i32, %c0_i32_0 : i32, i32
  }
  func.func @transform_4(%arg0: i32) -> (i32, i32) {
    %c0_i32 = arith.constant 0 : i32
    %c0_i32_0 = arith.constant 0 : i32
    %c0_i32_1 = arith.constant 0 : i32
    return %c0_i32, %c0_i32_0 : i32, i32
  }
  func.func @transform_5(%arg0: i32) -> (i32, i32) {
    %c0_i32 = arith.constant 0 : i32
    %c0_i32_0 = arith.constant 0 : i32
    %c0_i32_1 = arith.constant 0 : i32
    return %c0_i32, %c0_i32_0 : i32, i32
  }
  func.func @transform_6(%arg0: i32) -> (i32, i32) {
    %c0_i32 = arith.constant 0 : i32
    %c0_i32_0 = arith.constant 0 : i32
    %c0_i32_1 = arith.constant 0 : i32
    return %c0_i32, %c0_i32_0 : i32, i32
  }
  func.func @transform_7(%arg0: i32) -> (i32, i32) {
    %c0_i32 = arith.constant 0 : i32
    %c0_i32_0 = arith.constant 0 : i32
    return %arg0, %c0_i32 : i32, i32
  }
}

</mosaic_0001>

<bundles_post_ra>
// kernel: tpu_custom_call.1
= control target key start
LH: loop header
LB: loop body
LE: loop exit
PB: predicated region body
PF: predicated region fallthrough
CT: control target
= control target key end

     0   :  { %12 = vsyncpa [#allocation3], 0  ;;  %s937_s0 = inlined_call_operand.hbm [shape: f32[8,2], index: 0, kind: input, shape index: {}]   ;;  %s938_s1 = inlined_call_operand.hbm [shape: f32[2,256], index: 1, kind: input, shape index: {}]   ;;  %s939_s2 = inlined_call_operand.hbm [shape: f32[1,256], index: 2, kind: input, shape index: {}]   ;;  %s940_s3 = inlined_call_operand.hbm [shape: f32[256,256], index: 3, kind: input, shape index: {}]   ;;  %s941_s4 = inlined_call_operand.hbm [shape: f32[1,256], index: 4, kind: input, shape index: {}]   ;;  %s942_s5 = inlined_call_operand.hbm [shape: f32[256,128], index: 5, kind: input, shape index: {}]   ;;  %s943_s6 = inlined_call_operand.hbm [shape: f32[1,128], index: 6, kind: input, shape index: {}]   ;;  %s944_s7 = inlined_call_operand.hbm [shape: f32[8,128], index: 7, kind: output, shape index: {}]  }
   0x1   :  { %13 = vsyncpa [#allocation6], 0 }
   0x2   :  { %14 = vsyncpa [#allocation9], 0 }
   0x3   :  { %15 = vsyncpa [#allocation12], 0 }
   0x4   :  { %16 = vsyncpa [#allocation4], 0  ;;  %s780_s24 = smov [#allocation5]   ;;  %s781_s26 = smov [#allocation8]  }
   0x5   :  { %s33_s25 = sshll.u32 %s780_s24, 4  ;;  %s52_s27 = sshll.u32 %s781_s26, 4  ;;  %s34_s25 = int_to_ptr.vmem [resolvable:$true] %s33_s25  ;;  %s834_s27 = int_to_ptr.vmem [resolvable:$true] %s52_s27 }
   0x6   :  { %s594_s30 = scalar_lea.hbm %s938_s1, 64 }
   0x7   :  { %p595_p0 = scmp.ne.s32.totalorder %s938_s1, %s594_s30  ;;  %p598_p1 = scmp.lt.u32.totalorder %s594_s30, %s938_s1 }
   0x9   :  { %p600_p2 = pnand %p598_p1, %p595_p0 }
   0xb   :  { %603 = shalt.err (!%p600_p2)
}
   0xc   :  { %s604_s12 = scalar_lea.vmem %s34_s25, 64  ;;  %p609_p4 = scmp.lt.s32.totalorder %s34_s25, %s34_s25 }
   0xd   :  { %p605_p3 = scmp.ne.s32.totalorder %s34_s25, %s604_s12  ;;  %p610_p5 = scmp.lt.s32.totalorder %s604_s12, %s604_s12 }
   0xf   :  { %p611_p6 = por %p610_p5, %p609_p4 }
  0x11   :  { %p612_p7 = pnand %p611_p6, %p605_p3 }
  0x13   :  { %615 = shalt.err (!%p612_p7)
}
  0x14   :  { %36 = dma.hbm_to_vmem [thread:$0]  %s938_s1, 64, %s34_s25, [#allocation6]  }
  0x15   :  { %s616_s17 = scalar_lea.hbm %s940_s3, 8192 }
  0x16   :  { %p617_p8 = scmp.ne.s32.totalorder %s940_s3, %s616_s17  ;;  %p620_p9 = scmp.lt.u32.totalorder %s616_s17, %s940_s3 }
  0x18   :  { %p622_p10 = pnand %p620_p9, %p617_p8 }
  0x1a   :  { %625 = shalt.err (!%p622_p10)
}
  0x1b   :  { %s626_s22 = scalar_lea.vmem %s834_s27, 8192  ;;  %p631_p12 = scmp.lt.s32.totalorder %s834_s27, %s834_s27 }
  0x1c   :  { %p627_p11 = scmp.ne.s32.totalorder %s834_s27, %s626_s22  ;;  %p632_p13 = scmp.lt.s32.totalorder %s626_s22, %s626_s22 }
  0x1e   :  { %p633_p0 = por %p632_p13, %p631_p12 }
  0x20   :  { %p634_p1 = pnand %p633_p0, %p627_p11 }
  0x22   :  { %637 = shalt.err (!%p634_p1)
}
  0x23   :  { %s782_s1 = smov 256   ;;  %s783_s23 = smov 16  }
  0x24   :  { %58 = dma.hbm_to_vmem [thread:$0]  %s940_s3, 8192, %s834_s27, [#allocation9], %s782_s1, %s782_s1, %s783_s23  }
  0x25   :  { %s784_s26 = smov [#allocation11]   ;;  %s638_s8 = scalar_lea.hbm %s942_s5, 4096 }
  0x26   :  { %s74_s28 = sshll.u32 %s784_s26, 4  ;;  %p639_p2 = scmp.ne.s32.totalorder %s942_s5, %s638_s8  ;;  %s75_s28 = int_to_ptr.vmem [resolvable:$true] %s74_s28 }
  0x27   :  { %p642_p3 = scmp.lt.u32.totalorder %s638_s8, %s942_s5 }
  0x29   :  { %p644_p4 = pnand %p642_p3, %p639_p2 }
  0x2b   :  { %647 = shalt.err (!%p644_p4)
}
  0x2c   :  { %s648_s13 = scalar_lea.vmem %s75_s28, 4096  ;;  %p653_p6 = scmp.lt.s32.totalorder %s75_s28, %s75_s28 }
  0x2d   :  { %p649_p5 = scmp.ne.s32.totalorder %s75_s28, %s648_s13  ;;  %p654_p7 = scmp.lt.s32.totalorder %s648_s13, %s648_s13 }
  0x2f   :  { %p655_p8 = por %p654_p7, %p653_p6 }
  0x31   :  { %p656_p9 = pnand %p655_p8, %p649_p5 }
  0x33   :  { %659 = shalt.err (!%p656_p9)
}
  0x34   :  { %s785_s3 = smov 128   ;;  %s786_s27 = smov 8  }
  0x35   :  { %80 = dma.hbm_to_vmem [thread:$0]  %s942_s5, 4096, %s75_s28, [#allocation12], %s785_s3, %s785_s3, %s786_s27  }
  0x36   :  { %s787_s16 = smov [#allocation2]   ;;  %s788_s18 = smov [#allocation7]  }
  0x37   :  { %s23_s17 = sshll.u32 %s787_s16, 4  ;;  %s43_s19 = sshll.u32 %s788_s18, 4  ;;  %s24_s17 = int_to_ptr.vmem [resolvable:$true] %s23_s17  ;;  %s44_s19 = int_to_ptr.vmem [resolvable:$true] %s43_s19 }
  0x38   :  { %s660_s22 = scalar_lea.hbm %s937_s0, 128 }
  0x39   :  { %p661_p10 = scmp.ne.s32.totalorder %s937_s0, %s660_s22  ;;  %p664_p11 = scmp.lt.u32.totalorder %s660_s22, %s937_s0 }
  0x3b   :  { %p666_p12 = pnand %p664_p11, %p661_p10 }
  0x3d   :  { %669 = shalt.err (!%p666_p12)
}
  0x3e   :  { %s670_s5 = scalar_lea.vmem %s24_s17, 128  ;;  %p675_p0 = scmp.lt.s32.totalorder %s24_s17, %s24_s17 }
  0x3f   :  { %p671_p13 = scmp.ne.s32.totalorder %s24_s17, %s670_s5  ;;  %p676_p1 = scmp.lt.s32.totalorder %s670_s5, %s670_s5 }
  0x41   :  { %p677_p2 = por %p676_p1, %p675_p0 }
  0x43   :  { %p678_p3 = pnand %p677_p2, %p671_p13 }
  0x45   :  { %681 = shalt.err (!%p678_p3)
}
  0x46   :  { %26 = dma.hbm_to_vmem [thread:$0]  %s937_s0, 128, %s24_s17, [#allocation3]  }
  0x47   :  { %s682_s8 = scalar_lea.hbm %s939_s2, 32 }
  0x48   :  { %p683_p4 = scmp.ne.s32.totalorder %s939_s2, %s682_s8  ;;  %p686_p5 = scmp.lt.u32.totalorder %s682_s8, %s939_s2 }
  0x4a   :  { %p688_p6 = pnand %p686_p5, %p683_p4 }
  0x4c   :  { %691 = shalt.err (!%p688_p6)
}
  0x4d   :  { %s692_s13 = scalar_lea.vmem %s44_s19, 32  ;;  %p697_p8 = scmp.lt.s32.totalorder %s44_s19, %s44_s19 }
  0x4e   :  { %p693_p7 = scmp.ne.s32.totalorder %s44_s19, %s692_s13  ;;  %p698_p9 = scmp.lt.s32.totalorder %s692_s13, %s692_s13 }
  0x50   :  { %p699_p10 = por %p698_p9, %p697_p8 }
  0x52   :  { %p700_p11 = pnand %p699_p10, %p693_p7 }
  0x54   :  { %703 = shalt.err (!%p700_p11)
}
  0x55   :  { %46 = dma.hbm_to_vmem [thread:$0]  %s939_s2, 32, %s44_s19, [#allocation6]  }
  0x56   :  { %s789_s27 = smov [#allocation10]   ;;  %s790_s15 = smov [#allocation13]  }
  0x57   :  { %s65_s14 = sshll.u32 %s789_s27, 4  ;;  %s87_s16 = sshll.u32 %s790_s15, 4  ;;  %s66_s14 = int_to_ptr.vmem [resolvable:$true] %s65_s14  ;;  %s88_s16 = int_to_ptr.vmem [resolvable:$true] %s87_s16 }
  0x58   :  { %s704_s20 = scalar_lea.hbm %s941_s4, 32 }
  0x59   :  { %p705_p12 = scmp.ne.s32.totalorder %s941_s4, %s704_s20  ;;  %p708_p13 = scmp.lt.u32.totalorder %s704_s20, %s941_s4 }
  0x5b   :  { %p710_p0 = pnand %p708_p13, %p705_p12 }
  0x5d   :  { %713 = shalt.err (!%p710_p0)
}
  0x5e   :  { %s714_s2 = scalar_lea.vmem %s66_s14, 32  ;;  %p719_p2 = scmp.lt.s32.totalorder %s66_s14, %s66_s14 }
  0x5f   :  { %p715_p1 = scmp.ne.s32.totalorder %s66_s14, %s714_s2  ;;  %p720_p3 = scmp.lt.s32.totalorder %s714_s2, %s714_s2 }
  0x61   :  { %p721_p4 = por %p720_p3, %p719_p2 }
  0x63   :  { %p722_p5 = pnand %p721_p4, %p715_p1 }
  0x65   :  { %725 = shalt.err (!%p722_p5)
}
  0x66   :  { %68 = dma.hbm_to_vmem [thread:$0]  %s941_s4, 32, %s66_s14, [#allocation9]  }
  0x67   :  { %s726_s26 = scalar_lea.hbm %s943_s6, 16 }
  0x68   :  { %p727_p6 = scmp.ne.s32.totalorder %s943_s6, %s726_s26  ;;  %p730_p7 = scmp.lt.u32.totalorder %s726_s26, %s943_s6 }
  0x6a   :  { %p732_p8 = pnand %p730_p7, %p727_p6 }
  0x6c   :  { %735 = shalt.err (!%p732_p8)
}
  0x6d   :  { %s736_s9 = scalar_lea.vmem %s88_s16, 16  ;;  %s740_s10 = scalar_lea.vmem %s88_s16, 32 }
  0x6e   :  { %p737_p9 = scmp.ne.s32.totalorder %s88_s16, %s736_s9  ;;  %p741_p10 = scmp.lt.s32.totalorder %s88_s16, %s88_s16 }
  0x6f   :  { %p742_p11 = scmp.lt.s32.totalorder %s740_s10, %s736_s9 }
  0x71   :  { %p743_p12 = por %p742_p11, %p741_p10 }
  0x73   :  { %p744_p13 = pnand %p743_p12, %p737_p9 }
  0x75   :  { %747 = shalt.err (!%p744_p13)
}
  0x76   :  { %90 = dma.hbm_to_vmem [thread:$0]  %s943_s6, 16, %s88_s16, [#allocation12]  }
  0x77   :  { %770 = dma.done.wait [#allocation3], 128  }
  0x78   :  { %771 = vsyncadd [#allocation3], 4294967168 }
  0x79   :  { %772 = dma.done.wait [#allocation6], 96  }
  0x7a   :  { %773 = vsyncadd [#allocation6], 4294967200 }
  0x7b   :  { %774 = dma.done.wait [#allocation9], 8224  }
  0x7c   :  { %775 = vsyncadd [#allocation9], 4294959072 }
  0x7d   :  { %776 = dma.done.wait [#allocation12], 4112  }
  0x7e   :  { %777 = vsyncadd [#allocation12], 4294963184  ;;  %v791_v0 = vmov 0   ;;  %v112_v1 = vld [vmem:[#allocation2] sm:$0xff]  ;;  %v170_v2 = vld [vmem:[#allocation8 + $0x8] sm:$0xff]  ;;  %v792_v16 = vmov 1  }
  0x7f   :  { %592 = vset.pattern.permute.xlu0 %v791_v0  ;;  %v172_v3 = vld [vmem:[#allocation8 + $0x18] sm:$0xff]  ;;  %v169_v5 = vld [vmem:[#allocation8] sm:$0xff]  ;;  %v171_v6 = vld [vmem:[#allocation8 + $0x10] sm:$0xff]  ;;  %s793_s6 = smov [#allocation14]  }
  0x80   :  { %116 = vperm.xlu0 %592, %v112_v1   ;;  %v482_v4 = vpack.c.bf16 %v172_v3, %v170_v2  ;;  %v174_v7 = vld [vmem:[#allocation8 + $0x28] sm:$0xff]  ;;  %v484_v8 = vpack.c.bf16 %v171_v6, %v169_v5  ;;  %v176_v9 = vld [vmem:[#allocation8 + $0x38] sm:$0xff]  ;;  %v173_v10 = vld [vmem:[#allocation8 + $0x20] sm:$0xff]  ;;  %s434_s12 = sshll.u32 %s793_s6, 4  ;;  %s435_s12 = int_to_ptr.vmem [resolvable:$true] %s434_s12 }
  0x81   :  { %v175_v11 = vld [vmem:[#allocation8 + $0x30] sm:$0xff]  ;;  %v486_v12 = vpack.c.bf16 %v176_v9, %v174_v7  ;;  %v178_v13 = vld [vmem:[#allocation8 + $0x48] sm:$0xff]  ;;  %v180_v14 = vld [vmem:[#allocation8 + $0x58] sm:$0xff]  ;;  %s748_s13 = scalar_lea.vmem %s435_s12, 128  ;;  %p753_p1 = scmp.lt.s32.totalorder %s435_s12, %s435_s12 }
  0x82   :  { %483 = vmatprep.subr.bf16.mxu0 %v482_v4  ;;  %v488_v15 = vpack.c.bf16 %v175_v11, %v173_v10  ;;  %v490_v17 = vpack.c.bf16 %v180_v14, %v178_v13  ;;  %v177_v18 = vld [vmem:[#allocation8 + $0x40] sm:$0xff]  ;;  %v179_v19 = vld [vmem:[#allocation8 + $0x50] sm:$0xff]  ;;  %v182_v20 = vld [vmem:[#allocation8 + $0x68] sm:$0xff]  ;;  %p749_p0 = scmp.ne.s32.totalorder %s435_s12, %s748_s13  ;;  %p754_p2 = scmp.lt.s32.totalorder %s748_s13, %s748_s13 }
  0x83   :  { %485 = vmatpush1.bf16.msra.mxu0 %v484_v8  ;;  %v184_v21 = vld [vmem:[#allocation8 + $0x78] sm:$0xff]  ;;  %v492_v22 = vpack.c.bf16 %v179_v19, %v177_v18  ;;  %v181_v24 = vld [vmem:[#allocation8 + $0x60] sm:$0xff]  ;;  %v183_v25 = vld [vmem:[#allocation8 + $0x70] sm:$0xff] }
  0x84   :  { %593 = vset.pattern.permute.xlu0 %v792_v16  ;;  %487 = vmatprep.subr.bf16.mxu0 %v486_v12  ;;  %v494_v23 = vpack.c.bf16 %v184_v21, %v182_v20  ;;  %v186_v26 = vld [vmem:[#allocation8 + $0x88] sm:$0xff]  ;;  %v188_v27 = vld [vmem:[#allocation8 + $0x98] sm:$0xff]  ;;  %v496_v28 = vpack.c.bf16 %v183_v25, %v181_v24  ;;  %v185_v30 = vld [vmem:[#allocation8 + $0x80] sm:$0xff]  ;;  %p755_p3 = por %p754_p2, %p753_p1 }
  0x85   :  { %135 = vperm.xlu0 %593, %v112_v1   ;;  %v498_v29 = vpack.c.bf16 %v188_v27, %v186_v26  ;;  %v187_v31 = vld [vmem:[#allocation8 + $0x90] sm:$0xff]  ;;  %v190_v32 = vld [vmem:[#allocation8 + $0xa8] sm:$0xff]  ;;  %v192_v33 = vld [vmem:[#allocation8 + $0xb8] sm:$0xff] }
  0x86   :  { %v500_v34 = vpack.c.bf16 %v187_v31, %v185_v30  ;;  %v502_v35 = vpack.c.bf16 %v192_v33, %v190_v32  ;;  %v189_v36 = vld [vmem:[#allocation8 + $0xa0] sm:$0xff]  ;;  %v191_v37 = vld [vmem:[#allocation8 + $0xb0] sm:$0xff]  ;;  %v194_v38 = vld [vmem:[#allocation8 + $0xc8] sm:$0xff]  ;;  %p756_p4 = pnand %p755_p3, %p749_p0 }
  0x87   :  { %489 = vmatpush1.bf16.msra.mxu0 %v488_v15  ;;  %v196_v39 = vld [vmem:[#allocation8 + $0xd8] sm:$0xff]  ;;  %v504_v40 = vpack.c.bf16 %v191_v37, %v189_v36  ;;  %v193_v42 = vld [vmem:[#allocation8 + $0xc0] sm:$0xff]  ;;  %v195_v43 = vld [vmem:[#allocation8 + $0xd0] sm:$0xff] }
  0x88   :  { %491 = vmatprep.subr.bf16.mxu0 %v490_v17  ;;  %v506_v41 = vpack.c.bf16 %v196_v39, %v194_v38  ;;  %v198_v44 = vld [vmem:[#allocation8 + $0xe8] sm:$0xff]  ;;  %v200_v45 = vld [vmem:[#allocation8 + $0xf8] sm:$0xff]  ;;  %v197_v47 = vld [vmem:[#allocation8 + $0xe0] sm:$0xff]  ;;  %v508_v52 = vpack.c.bf16 %v195_v43, %v193_v42 }
  0x89   :  { %v334_v46 = vld [vmem:[#allocation11 + $0x80] sm:$0xff]  ;;  %v199_v48 = vld [vmem:[#allocation8 + $0xf0] sm:$0xff]  ;;  %v337_v56 = vld [vmem:[#allocation11 + $0x98] sm:$0xff]  ;;  %v510_v58 = vpack.c.bf16 %v200_v45, %v198_v44 }
  0x8a   :  { %v335_v49 = vld [vmem:[#allocation11 + $0x88] sm:$0xff]  ;;  %v318_v50 = vld [vmem:[#allocation11] sm:$0xff]  ;;  %v336_v55 = vld [vmem:[#allocation11 + $0x90] sm:$0xff]  ;;  %v512_v2 = vpack.c.bf16 %v199_v48, %v197_v47 }
  0x8b   :  { %493 = vmatpush1.bf16.msra.mxu0 %v492_v22  ;;  %v319_v51 = vld [vmem:[#allocation11 + $0x8] sm:$0xff]  ;;  %v546_v53 = vpack.c.bf16 %v335_v49, %v334_v46  ;;  %v320_v57 = vld [vmem:[#allocation11 + $0x10] sm:$0xff]  ;;  %v550_v59 = vpack.c.bf16 %v337_v56, %v336_v55  ;;  %v321_v60 = vld [vmem:[#allocation11 + $0x18] sm:$0xff] }
  0x8c   :  { %495 = vmatprep.subr.bf16.mxu0 %v494_v23  ;;  %v548_v54 = vpack.c.bf16 %v319_v51, %v318_v50  ;;  %v338_v61 = vld [vmem:[#allocation11 + $0xa0] sm:$0xff]  ;;  %v339_v62 = vld [vmem:[#allocation11 + $0xa8] sm:$0xff]  ;;  %v204_v0 = vld [vmem:[#allocation8 + $0x118] sm:$0xff]  ;;  %v552_v1 = vpack.c.bf16 %v321_v60, %v320_v57 }
  0x8d   :  { %v202_v63 = vld [vmem:[#allocation8 + $0x108] sm:$0xff]  ;;  %547 = vmatprep.subr.bf16.mxu1 %v546_v53  ;;  %v201_v3 = vld [vmem:[#allocation8 + $0x100] sm:$0xff]  ;;  %v554_v4 = vpack.c.bf16 %v339_v62, %v338_v61  ;;  %v203_v8 = vld [vmem:[#allocation8 + $0x110] sm:$0xff] }
  0x8e   :  { %549 = vmatpush3.bf16.msra.mxu1 %v548_v54  ;;  %v322_v5 = vld [vmem:[#allocation11 + $0x20] sm:$0xff]  ;;  %v323_v6 = vld [vmem:[#allocation11 + $0x28] sm:$0xff]  ;;  %v514_v7 = vpack.c.bf16 %v204_v0, %v202_v63  ;;  %v340_v9 = vld [vmem:[#allocation11 + $0xb0] sm:$0xff]  ;;  %v516_v14 = vpack.c.bf16 %v203_v8, %v201_v3 }
  0x8f   :  { %497 = vmatpush1.bf16.msra.mxu0 %v496_v28  ;;  %551 = vmatprep.subr.bf16.mxu1 %v550_v59  ;;  %v341_v10 = vld [vmem:[#allocation11 + $0xb8] sm:$0xff]  ;;  %v206_v11 = vld [vmem:[#allocation8 + $0x128] sm:$0xff]  ;;  %v556_v13 = vpack.c.bf16 %v323_v6, %v322_v5  ;;  %v324_v17 = vld [vmem:[#allocation11 + $0x30] sm:$0xff] }
  0x90   :  { %499 = vmatprep.subr.bf16.mxu0 %v498_v29  ;;  %v208_v12 = vld [vmem:[#allocation8 + $0x138] sm:$0xff]  ;;  %v205_v15 = vld [vmem:[#allocation8 + $0x120] sm:$0xff]  ;;  %v558_v16 = vpack.c.bf16 %v341_v10, %v340_v9  ;;  %v207_v20 = vld [vmem:[#allocation8 + $0x130] sm:$0xff]  ;;  %v120_v10 = vlaneseq }
  0x91   :  { %v325_v18 = vld [vmem:[#allocation11 + $0x38] sm:$0xff]  ;;  %v518_v19 = vpack.c.bf16 %v208_v12, %v206_v11  ;;  %v342_v21 = vld [vmem:[#allocation11 + $0xc0] sm:$0xff]  ;;  %v343_v22 = vld [vmem:[#allocation11 + $0xc8] sm:$0xff]  ;;  %v520_v26 = vpack.c.bf16 %v207_v20, %v205_v15 }
  0x92   :  { %553 = vmatpush3.bf16.msra.mxu1 %v552_v1  ;;  %v210_v23 = vld [vmem:[#allocation8 + $0x148] sm:$0xff]  ;;  %v212_v24 = vld [vmem:[#allocation8 + $0x158] sm:$0xff]  ;;  %v560_v25 = vpack.c.bf16 %v325_v18, %v324_v17  ;;  %v209_v27 = vld [vmem:[#allocation8 + $0x140] sm:$0xff]  ;;  %v562_v28 = vpack.c.bf16 %v343_v22, %v342_v21  ;;  %v121_v11 = vshrl.u32 %v120_v10, 7 }
  0x93   :  { %501 = vmatpush1.bf16.msra.mxu0 %v500_v34  ;;  %555 = vmatprep.subr.bf16.mxu1 %v554_v4  ;;  %v326_v29 = vld [vmem:[#allocation11 + $0x40] sm:$0xff]  ;;  %v327_v30 = vld [vmem:[#allocation11 + $0x48] sm:$0xff]  ;;  %v522_v31 = vpack.c.bf16 %v212_v24, %v210_v23  ;;  %v344_v33 = vld [vmem:[#allocation11 + $0xd0] sm:$0xff] }
  0x94   :  { %503 = vmatprep.subr.bf16.mxu0 %v502_v35  ;;  %v211_v32 = vld [vmem:[#allocation8 + $0x150] sm:$0xff]  ;;  %v345_v34 = vld [vmem:[#allocation11 + $0xd8] sm:$0xff]  ;;  %v214_v35 = vld [vmem:[#allocation8 + $0x168] sm:$0xff]  ;;  %v564_v37 = vpack.c.bf16 %v327_v30, %v326_v29  ;;  %v122_v12 = vsub.s32 0, %v121_v11 }
  0x95   :  { %v216_v36 = vld [vmem:[#allocation8 + $0x178] sm:$0xff]  ;;  %v524_v38 = vpack.c.bf16 %v211_v32, %v209_v27  ;;  %v213_v39 = vld [vmem:[#allocation8 + $0x160] sm:$0xff]  ;;  %v215_v44 = vld [vmem:[#allocation8 + $0x170] sm:$0xff] }
  0x96   :  { %557 = vmatpush3.bf16.msra.mxu1 %v556_v13  ;;  %v329_v42 = vld [vmem:[#allocation11 + $0x58] sm:$0xff]  ;;  %v526_v43 = vpack.c.bf16 %v216_v36, %v214_v35  ;;  %v346_v45 = vld [vmem:[#allocation11 + $0xe0] sm:$0xff]  ;;  %v347_v46 = vld [vmem:[#allocation11 + $0xe8] sm:$0xff]  ;;  %v528_v50 = vpack.c.bf16 %v215_v44, %v213_v39  ;;  %v126_v13 = vsub.s32 1, %v121_v11 }
  0x97   :  { %505 = vmatpush1.bf16.msra.mxu0 %v504_v40  ;;  %559 = vmatprep.subr.bf16.mxu1 %v558_v16  ;;  %v566_v40 = vpack.c.bf16 %v345_v34, %v344_v33  ;;  %v218_v47 = vld [vmem:[#allocation8 + $0x188] sm:$0xff]  ;;  %v220_v48 = vld [vmem:[#allocation8 + $0x198] sm:$0xff]  ;;  %v570_v51 = vpack.c.bf16 %v347_v46, %v346_v45  ;;  %v217_v53 = vld [vmem:[#allocation8 + $0x180] sm:$0xff] }
  0x98   :  { %507 = vmatprep.subr.bf16.mxu0 %v506_v41  ;;  %v328_v41 = vld [vmem:[#allocation11 + $0x50] sm:$0xff]  ;;  %v222_v55 = vld [vmem:[#allocation8 + $0x1a8] sm:$0xff]  ;;  %v221_v59 = vld [vmem:[#allocation8 + $0x1a0] sm:$0xff] }
  0x99   :  { %v568_v49 = vpack.c.bf16 %v329_v42, %v328_v41  ;;  %v219_v54 = vld [vmem:[#allocation8 + $0x190] sm:$0xff]  ;;  %v224_v56 = vld [vmem:[#allocation8 + $0x1b8] sm:$0xff]  ;;  %v226_v61 = vld [vmem:[#allocation8 + $0x1c8] sm:$0xff] }
  0x9a   :  { %561 = vmatpush3.bf16.msra.mxu1 %v560_v25  ;;  %v532_v57 = vpack.c.bf16 %v219_v54, %v217_v53  ;;  %v223_v60 = vld [vmem:[#allocation8 + $0x1b0] sm:$0xff]  ;;  %v228_v62 = vld [vmem:[#allocation8 + $0x1d8] sm:$0xff]  ;;  %v225_v1 = vld [vmem:[#allocation8 + $0x1c0] sm:$0xff] }
  0x9b   :  { %509 = vmatpush1.bf16.msra.mxu0 %v508_v52  ;;  %563 = vmatprep.subr.bf16.mxu1 %v562_v28  ;;  %v530_v52 = vpack.c.bf16 %v220_v48, %v218_v47  ;;  %v536_v63 = vpack.c.bf16 %v223_v60, %v221_v59  ;;  %v538_v0 = vpack.c.bf16 %v228_v62, %v226_v61  ;;  %v230_v3 = vld [vmem:[#allocation8 + $0x1e8] sm:$0xff]  ;;  %v232_v4 = vld [vmem:[#allocation8 + $0x1f8] sm:$0xff]  ;;  %v231_v8 = vld [vmem:[#allocation8 + $0x1f0] sm:$0xff] }
  0x9c   :  { %511 = vmatprep.subr.bf16.mxu0 %v510_v58  ;;  %v534_v58 = vpack.c.bf16 %v224_v56, %v222_v55  ;;  %v542_v6 = vpack.c.bf16 %v232_v4, %v230_v3  ;;  %v133_v15 = vld [vmem:[#allocation5 + $0x1] ss:$2 sm:$0x3]  ;;  %v153_v21 = vld [vmem:[#allocation7] sm:$0x3]  ;;  %v330_v35 = vld [vmem:[#allocation11 + $0x60] sm:$0xff] }
  0x9d   :  { %v146_v20 = vrot.slane %v133_v15, %v126_v13  ;;  %v158_v23 = vrot.slane %v153_v21, %v122_v12  ;;  %v162_v24 = vrot.slane %v153_v21, %v126_v13  ;;  %v331_v36 = vld [vmem:[#allocation11 + $0x68] sm:$0xff]  ;;  %v349_v39 = vld [vmem:[#allocation11 + $0xf8] sm:$0xff]  ;;  %v332_v41 = vld [vmem:[#allocation11 + $0x70] sm:$0xff] }
  0x9e   :  { %565 = vmatpush3.bf16.msra.mxu1 %v564_v37  ;;  %v572_v37 = vpack.c.bf16 %v331_v36, %v330_v35  ;;  %v333_v42 = vld [vmem:[#allocation11 + $0x78] sm:$0xff]  ;;  %v446_v54 = vld [vmem:[#allocation13] ss:$0 sm:$0xff] }
  0x9f   :  { %513 = vmatpush1.bf16.msra.mxu0 %v512_v2  ;;  %567 = vmatprep.subr.bf16.mxu1 %v566_v40  ;;  %v227_v2 = vld [vmem:[#allocation8 + $0x1d0] sm:$0xff]  ;;  %v233_v44 = vld [vmem:[#allocation10] sm:$0x3] }
  0xa0   :  { %515 = vmatprep.subr.bf16.mxu0 %v514_v7  ;;  %v540_v5 = vpack.c.bf16 %v227_v2, %v225_v1  ;;  %v229_v7 = vld [vmem:[#allocation8 + $0x1e0] sm:$0xff]  ;;  %v238_v45 = vrot.slane %v233_v44, %v122_v12  ;;  %v242_v46 = vrot.slane %v233_v44, %v126_v13 }
  0xa1   :  { %v544_v9 = vpack.c.bf16 %v231_v8, %v229_v7 }
  0xa2   :  { %569 = vmatpush3.bf16.msra.mxu1 %v568_v49 }
  0xa3   :  { %517 = vmatpush1.bf16.msra.mxu0 %v516_v14  ;;  %571 = vmatprep.subr.bf16.mxu1 %v570_v51  ;;  %v113_v14 = vld [vmem:[#allocation5] ss:$2 sm:$0x3] }
  0xa4   :  { %519 = vmatprep.subr.bf16.mxu0 %v518_v19  ;;  %v123_v17 = vrot.slane %v113_v14, %v122_v12  ;;  %v127_v18 = vrot.slane %v113_v14, %v126_v13  ;;  %v142_v19 = vrot.slane %v133_v15, %v122_v12 }
  0xa6   :  { %573 = vmatpush3.bf16.msra.mxu1 %v572_v37 }
  0xa7   :  { %521 = vmatpush1.bf16.msra.mxu0 %v520_v26 }
  0xa8   :  { %523 = vmatprep.subr.bf16.mxu0 %v522_v31 }
  0xab   :  { %525 = vmatpush1.bf16.msra.mxu0 %v524_v38  ;;  %v348_v38 = vld [vmem:[#allocation11 + $0xf0] sm:$0xff] }
  0xac   :  { %527 = vmatprep.subr.bf16.mxu0 %v526_v43  ;;  %v574_v40 = vpack.c.bf16 %v349_v39, %v348_v38  ;;  %v576_v43 = vpack.c.bf16 %v333_v42, %v332_v41 }
  0xae   :  { %575 = vmatprep.subr.bf16.mxu1 %v574_v40 }
  0xaf   :  { %529 = vmatpush1.bf16.msra.mxu0 %v528_v50  ;;  %577 = vmatpush3.bf16.msra.mxu1 %v576_v43 }
  0xb0   :  { %531 = vmatprep.subr.bf16.mxu0 %v530_v52 }
  0xb3   :  { %533 = vmatpush1.bf16.msra.mxu0 %v532_v57 }
  0xb4   :  { %535 = vmatprep.subr.bf16.mxu0 %v534_v58 }
  0xb7   :  { %537 = vmatpush1.bf16.msra.mxu0 %v536_v63 }
  0xb8   :  { %539 = vmatprep.subr.bf16.mxu0 %v538_v0 }
  0xbb   :  { %541 = vmatpush1.bf16.msra.mxu0 %v540_v5 }
  0xbc   :  { %543 = vmatprep.subr.bf16.mxu0 %v542_v6 }
  0xbf   :  { %545 = vmatpush1.bf16.msra.mxu0 %v544_v9 }
  0xff   :  { %v117_v16 = vpop.permute.xlu0 %116 }
 0x100   :  { %v130_v25 = vmul.f32 %v123_v17, %v117_v16  ;;  %v131_v26 = vmul.f32 %v127_v18, %v117_v16 }
 0x104   :  { %v136_v22 = vpop.permute.xlu0 %135 }
 0x105   :  { %v149_v27 = vmul.f32 %v142_v19, %v136_v22  ;;  %v150_v28 = vmul.f32 %v146_v20, %v136_v22 }
 0x107   :  { %v151_v29 = vadd.f32 %v149_v27, %v130_v25  ;;  %v152_v30 = vadd.f32 %v150_v28, %v131_v26 }
 0x109   :  { %v166_v31 = vadd.f32 %v162_v24, %v152_v30  ;;  %v165_v32 = vadd.f32 %v158_v23, %v151_v29 }
 0x10b   :  { %v168_v33 = vmax.f32 %v166_v31, 0.0  ;;  %v167_v34 = vmax.f32 %v165_v32, 0.0 }
 0x10d   :  { %309 = vmatprep.mubr.f32.mxu0 %v168_v33 }
 0x10e   :  { %310 = vmatmul.mubr.f32.vlgmr.msra.gmra.mrb[0].mxu0 %v167_v34 }
 0x1e1   :  { %v311_v47 = vpop.f32.mrb[0].mxu0 }
 0x1e2   :  { %v312_v48 = vadd.f32 %v311_v47, %v238_v45  ;;  %v313_v49 = vpop.f32.mrb[1].mxu0 }
 0x1e3   :  { %v314_v50 = vadd.f32 %v313_v49, %v242_v46 }
 0x1e4   :  { %v316_v52 = vmax.f32 %v312_v48, 0.0 }
 0x1e5   :  { %v317_v51 = vmax.f32 %v314_v50, 0.0 }
 0x1e7   :  { %421 = vmatprep.mubr.f32.mxu1 %v317_v51 }
 0x1e8   :  { %422 = vmatmul.mubr.f32.vlgmr.msra.gmra.mrb[0].mxu1 %v316_v52 }
 0x2bb   :  { %v479_v53 = vpop.f32.mrb[0].mxu1 }
 0x2bc   :  { %v480_v55 = vpop.f32.mrb[1].mxu1 }
 0x2bd   :  { %v481_v56 = vadd.f32 %v480_v55, %v479_v53 }
 0x2bf   :  { %v424_v57 = vadd.f32 %v481_v56, %v446_v54 }
 0x2c1   :  { %427 = vst [vmem:[#allocation14] sm:$0xff] %v424_v57 }
 0x2c2   :  { %759 = shalt.err (!%p756_p4)
}
 0x2c3   :  { %s760_s27 = scalar_lea.hbm %s944_s7, 128 }
 0x2c4   :  { %p761_p5 = scmp.ne.s32.totalorder %s944_s7, %s760_s27  ;;  %p764_p6 = scmp.lt.u32.totalorder %s760_s27, %s944_s7 }
 0x2c6   :  { %p766_p7 = pnand %p764_p6, %p761_p5 }
 0x2c8   :  { %769 = shalt.err (!%p766_p7)
}
 0x2c9   :  { %437 = dma.vmem_to_hbm [thread:$0]  %s435_s12, 128, %s944_s7, [#allocation4]  }
 0x2ca   :  { %778 = dma.done.wait [#allocation4], 128  }
 0x2cb   :  { %779 = vsyncadd [#allocation4], 4294967168 }
 0x2cc   :  { %441 = vsyncpa [#allocation3], 1 }
 0x2cd   :  { %442 = vsyncpa [#allocation6], 1 }
 0x2ce   :  { %443 = vsyncpa [#allocation9], 1 }
 0x2cf   :  { %444 = vsyncpa [#allocation12], 1 }
 0x2d0   :  { %445 = vsyncpa [#allocation4], 1 }

</bundles_post_ra>
